<compile_context>
chip_gen: v7x
topology: tpu7x:2x2x1
jax: 0.10.0
libtpu: 0.0.40
codegen_flags: <defaults>
</compile_context>

<pallas_src>
import functools

import jax
import jax.numpy as jnp
from jax.experimental import pallas as pl
from jax.experimental.pallas import tpu as pltpu


def _fused_av_kernel(xa_ref, wa_ref, ba_ref,      # audio inputs
                     xq_ref, wt_ref, bv_ref,      # video inputs
                     oa_ref, ov_ref,              # outputs
                     *, wp, out_cols):
    # ---------------- audio branch: (T, F) @ (F, H) + b, ReLU ----------------
    a = jnp.dot(xa_ref[0], wa_ref[...], preferred_element_type=jnp.float32)
    a = a + ba_ref[...]
    oa_ref[0] = jnp.maximum(a, 0.0).astype(oa_ref.dtype)

    # -------- video branch: 3x3 / pad=1 conv as 9 shifted MXU matmuls --------
    # xq_ref[0] is the zero-padded NCHW input with spatial flattened to
    # (C_in, rows*wp).  For tap (kh, kw) the needed samples for every output
    # position are the contiguous window starting at kh*wp + kw, so each tap
    # is one (C_out, C_in) @ (C_in, H*wp) matmul accumulated in f32.  The two
    # right-most columns of each wp-wide output row are wrap-around garbage
    # and get sliced off outside the kernel.
    c_out = ov_ref.shape[1]
    acc = jnp.zeros((c_out, out_cols), jnp.float32)
    for kh in range(3):
        for kw in range(3):
            off = kh * wp + kw
            tap = xq_ref[0, :, off:off + out_cols]        # (C_in, out_cols)
            w_k = wt_ref[kh * 3 + kw]                     # (C_out, C_in)
            acc = acc + jnp.dot(w_k, tap,
                                preferred_element_type=jnp.float32)
    acc = acc + bv_ref[...]                               # (C_out, 1) bcast
    ov_ref[0] = jnp.maximum(acc, 0.0).astype(ov_ref.dtype)


def combined_network_av(input_audio, input_video, audio_params, video_params):
    B, T, F = input_audio.shape
    Bv, C_in, H, W = input_video.shape
    assert B == Bv
    wa, ba = audio_params["w"], audio_params["b"]        # (F, Hd), (Hd,)
    wv, bv = video_params["w"], video_params["b"]        # (C_out, C_in, 3, 3), (C_out,)
    Hd = wa.shape[1]
    C_out = wv.shape[0]

    wp = W + 2                 # zero-padded row width
    out_cols = H * wp          # kernel-side output columns per channel
    rows = H + 3               # top halo + bottom halo + 1 slack row so every
                               # tap window stays in-bounds when flattened

    # Layout-only glue (tiny, no 9x patch expansion):
    xq = jnp.pad(input_video, ((0, 0), (0, 0), (1, 2), (1, 1)))
    xq = xq.reshape(B, C_in, rows * wp)                   # (B, C_in, rows*wp)
    # Per-tap weight matrices, tap index = kh*3 + kw.
    wt = jnp.transpose(wv, (2, 3, 0, 1)).reshape(9, C_out, C_in)
    ba2 = ba.reshape(1, Hd)
    bv2 = bv.reshape(C_out, 1)

    kernel = functools.partial(_fused_av_kernel, wp=wp, out_cols=out_cols)

    audio_out, video_flat = pl.pallas_call(
        kernel,
        out_shape=(
            jax.ShapeDtypeStruct((B, T, Hd), jnp.float32),
            jax.ShapeDtypeStruct((B, C_out, out_cols), jnp.float32),
        ),
        grid=(B,),
        in_specs=[
            pl.BlockSpec((1, T, F), lambda b: (b, 0, 0)),            # audio x
            pl.BlockSpec((F, Hd), lambda b: (0, 0)),                 # audio W
            pl.BlockSpec((1, Hd), lambda b: (0, 0)),                 # audio b
            pl.BlockSpec((1, C_in, rows * wp), lambda b: (b, 0, 0)), # video x
            pl.BlockSpec((9, C_out, C_in), lambda b: (0, 0, 0)),     # conv W
            pl.BlockSpec((C_out, 1), lambda b: (0, 0)),              # conv b
        ],
        out_specs=(
            pl.BlockSpec((1, T, Hd), lambda b: (b, 0, 0)),
            pl.BlockSpec((1, C_out, out_cols), lambda b: (b, 0, 0)),
        ),
        compiler_params=pltpu.CompilerParams(
            dimension_semantics=("parallel",)),
    )(input_audio, wa, ba2, xq, wt, bv2)

    # Free reshape + tiny slice dropping the 2 padded columns per spatial row;
    # result is already NCHW channel-major (no transpose needed).
    video_out = video_flat.reshape(B, C_out, H, wp)[:, :, :, :W]
    return {"audio": audio_out, "video": video_out}


def init_params():
    key = jax.random.PRNGKey(0)
    k_aw, k_ab, k_vw, k_vb = jax.random.split(key, 4)
    F, Hd = 32, 64
    C_in, C_out = 4, 8
    audio_params = {
        "w": jax.random.normal(k_aw, (F, Hd), jnp.float32) * 0.05,
        "b": jax.random.normal(k_ab, (Hd,), jnp.float32) * 0.05,
    }
    video_params = {
        "w": jax.random.normal(k_vw, (C_out, C_in, 3, 3), jnp.float32) * 0.05,
        "b": jax.random.normal(k_vb, (C_out,), jnp.float32) * 0.05,
    }
    return audio_params, video_params


def _reference(input_audio, input_video, audio_params, video_params):
    a = jnp.einsum("btf,fh->bth", input_audio, audio_params["w"])
    a = jnp.maximum(a + audio_params["b"], 0.0)
    v = jax.lax.conv_general_dilated(
        input_video, video_params["w"], window_strides=(1, 1), padding="SAME",
        dimension_numbers=("NCHW", "OIHW", "NCHW"))
    v = jnp.maximum(v + video_params["b"][None, :, None, None], 0.0)
    return {"audio": a, "video": v}


if __name__ == "__main__":
    key = jax.random.PRNGKey(0)
    k_a, k_v = jax.random.split(key)

    B, T, F = 2, 8, 32                 # audio: (batch, seq, features)
    C_in, Hh, Ww = 4, 16, 16           # video: NCHW

    input_audio = jax.random.normal(k_a, (B, T, F), jnp.float32)
    input_video = jax.random.normal(k_v, (B, C_in, Hh, Ww), jnp.float32)

    audio_params, video_params = init_params()

    out = jax.jit(combined_network_av)(
        input_audio, input_video, audio_params, video_params)
    jax.block_until_ready(out)

    assert out["audio"].shape == (B, T, 64)
    assert out["video"].shape == (B, 8, Hh, Ww)

    ref = _reference(input_audio, input_video, audio_params, video_params)
    assert jnp.allclose(out["audio"], ref["audio"], atol=2e-4, rtol=2e-4)
    assert jnp.allclose(out["video"], ref["video"], atol=2e-4, rtol=2e-4)

    print("KERNEL_OK")
</pallas_src>

<mosaic_0001>
module attributes {stable_mosaic.version = 11 : i64} {
  func.func @_fused_av_kernel(%arg0: i32, %arg1: memref<1x8x32xf32, #tpu.memory_space<vmem>>, %arg2: memref<32x64xf32, #tpu.memory_space<vmem>>, %arg3: memref<1x64xf32, #tpu.memory_space<vmem>>, %arg4: memref<1x4x342xf32, #tpu.memory_space<vmem>>, %arg5: memref<9x8x4xf32, #tpu.memory_space<vmem>>, %arg6: memref<8x1xf32, #tpu.memory_space<vmem>>, %arg7: memref<1x8x64xf32, #tpu.memory_space<vmem>>, %arg8: memref<1x8x288xf32, #tpu.memory_space<vmem>>) attributes {dimension_semantics = [#tpu.dimension_semantics<parallel>], iteration_bounds = array<i64: 2>, scalar_prefetch = 0 : i64, scratch_operands = 0 : i64, tpu.core_type = #tpu.core_type<tc>, window_params = [{transform_indices = @transform_0, window_bounds = array<i64: 1, 8, 32>}, {pipeline_mode = #tpu.pipeline_mode<synchronous>, transform_indices = @transform_1, window_bounds = array<i64: 32, 64>}, {pipeline_mode = #tpu.pipeline_mode<synchronous>, transform_indices = @transform_2, window_bounds = array<i64: 1, 64>}, {transform_indices = @transform_3, window_bounds = array<i64: 1, 4, 342>}, {pipeline_mode = #tpu.pipeline_mode<synchronous>, transform_indices = @transform_4, window_bounds = array<i64: 9, 8, 4>}, {pipeline_mode = #tpu.pipeline_mode<synchronous>, transform_indices = @transform_5, window_bounds = array<i64: 8, 1>}, {transform_indices = @transform_6, window_bounds = array<i64: 1, 8, 64>}, {transform_indices = @transform_7, window_bounds = array<i64: 1, 8, 288>}]} {
    %c0 = arith.constant 0 : index
    %c0_0 = arith.constant 0 : index
    %c0_1 = arith.constant 0 : index
    %0 = vector.load %arg1[%c0, %c0_0, %c0_1] : memref<1x8x32xf32, #tpu.memory_space<vmem>>, vector<1x8x32xf32>
    %1 = vector.shape_cast %0 : vector<1x8x32xf32> to vector<8x32xf32>
    %c0_2 = arith.constant 0 : index
    %c0_3 = arith.constant 0 : index
    %2 = vector.load %arg2[%c0_2, %c0_3] : memref<32x64xf32, #tpu.memory_space<vmem>>, vector<32x64xf32>
    %cst = arith.constant dense<0.000000e+00> : vector<8x64xf32>
    %3 = tpu.matmul %1, %2, %cst {dimension_numbers = #tpu.dot_dimension_numbers<[1], [0], [0], [1], [0, 0, 1, 1], [], []>} : vector<8x32xf32>, vector<32x64xf32>, vector<8x64xf32> -> vector<8x64xf32>
    %c0_4 = arith.constant 0 : index
    %c0_5 = arith.constant 0 : index
    %4 = vector.load %arg3[%c0_4, %c0_5] : memref<1x64xf32, #tpu.memory_space<vmem>>, vector<1x64xf32>
    %5 = vector.broadcast %4 : vector<1x64xf32> to vector<8x64xf32>
    %6 = arith.addf %3, %5 : vector<8x64xf32>
    %cst_6 = arith.constant 0.000000e+00 : f32
    %7 = vector.broadcast %cst_6 : f32 to vector<8x64xf32>
    %8 = arith.maximumf %6, %7 : vector<8x64xf32>
    %c0_7 = arith.constant 0 : index
    %c0_8 = arith.constant 0 : index
    %c0_9 = arith.constant 0 : index
    %9 = vector.load %arg7[%c0_7, %c0_8, %c0_9] : memref<1x8x64xf32, #tpu.memory_space<vmem>>, vector<1x8x64xf32>
    %10 = vector.shape_cast %9 : vector<1x8x64xf32> to vector<8x64xf32>
    %11 = vector.shape_cast %8 : vector<8x64xf32> to vector<1x8x64xf32>
    tpu.vector_store %arg7[%c0_7, %c0_8, %c0_9], %11 {strides = array<i32>} : memref<1x8x64xf32, #tpu.memory_space<vmem>>, vector<1x8x64xf32>,
    %cst_10 = arith.constant 0.000000e+00 : f32
    %12 = vector.broadcast %cst_10 : f32 to vector<8x288xf32>
    %c0_11 = arith.constant 0 : index
    %c0_12 = arith.constant 0 : index
    %c0_13 = arith.constant 0 : index
    %13 = vector.load %arg4[%c0_11, %c0_12, %c0_13] : memref<1x4x342xf32, #tpu.memory_space<vmem>>, vector<1x4x288xf32>
    %14 = vector.shape_cast %13 : vector<1x4x288xf32> to vector<4x288xf32>
    %c0_14 = arith.constant 0 : index
    %c0_15 = arith.constant 0 : index
    %c0_16 = arith.constant 0 : index
    %15 = vector.load %arg5[%c0_14, %c0_15, %c0_16] : memref<9x8x4xf32, #tpu.memory_space<vmem>>, vector<1x8x4xf32>
    %16 = vector.shape_cast %15 : vector<1x8x4xf32> to vector<8x4xf32>
    %cst_17 = arith.constant dense<0.000000e+00> : vector<8x288xf32>
    %17 = tpu.matmul %16, %14, %cst_17 {dimension_numbers = #tpu.dot_dimension_numbers<[1], [0], [0], [1], [0, 0, 1, 1], [], []>} : vector<8x4xf32>, vector<4x288xf32>, vector<8x288xf32> -> vector<8x288xf32>
    %18 = arith.addf %12, %17 : vector<8x288xf32>
    %c0_18 = arith.constant 0 : index
    %c0_19 = arith.constant 0 : index
    %c1 = arith.constant 1 : index
    %19 = vector.load %arg4[%c0_18, %c0_19, %c1] : memref<1x4x342xf32, #tpu.memory_space<vmem>>, vector<1x4x288xf32>
    %20 = vector.shape_cast %19 : vector<1x4x288xf32> to vector<4x288xf32>
    %c1_20 = arith.constant 1 : index
    %c0_21 = arith.constant 0 : index
    %c0_22 = arith.constant 0 : index
    %21 = vector.load %arg5[%c1_20, %c0_21, %c0_22] : memref<9x8x4xf32, #tpu.memory_space<vmem>>, vector<1x8x4xf32>
    %22 = vector.shape_cast %21 : vector<1x8x4xf32> to vector<8x4xf32>
    %cst_23 = arith.constant dense<0.000000e+00> : vector<8x288xf32>
    %23 = tpu.matmul %22, %20, %cst_23 {dimension_numbers = #tpu.dot_dimension_numbers<[1], [0], [0], [1], [0, 0, 1, 1], [], []>} : vector<8x4xf32>, vector<4x288xf32>, vector<8x288xf32> -> vector<8x288xf32>
    %24 = arith.addf %18, %23 : vector<8x288xf32>
    %c0_24 = arith.constant 0 : index
    %c0_25 = arith.constant 0 : index
    %c2 = arith.constant 2 : index
    %25 = vector.load %arg4[%c0_24, %c0_25, %c2] : memref<1x4x342xf32, #tpu.memory_space<vmem>>, vector<1x4x288xf32>
    %26 = vector.shape_cast %25 : vector<1x4x288xf32> to vector<4x288xf32>
    %c2_26 = arith.constant 2 : index
    %c0_27 = arith.constant 0 : index
    %c0_28 = arith.constant 0 : index
    %27 = vector.load %arg5[%c2_26, %c0_27, %c0_28] : memref<9x8x4xf32, #tpu.memory_space<vmem>>, vector<1x8x4xf32>
    %28 = vector.shape_cast %27 : vector<1x8x4xf32> to vector<8x4xf32>
    %cst_29 = arith.constant dense<0.000000e+00> : vector<8x288xf32>
    %29 = tpu.matmul %28, %26, %cst_29 {dimension_numbers = #tpu.dot_dimension_numbers<[1], [0], [0], [1], [0, 0, 1, 1], [], []>} : vector<8x4xf32>, vector<4x288xf32>, vector<8x288xf32> -> vector<8x288xf32>
    %30 = arith.addf %24, %29 : vector<8x288xf32>
    %c0_30 = arith.constant 0 : index
    %c0_31 = arith.constant 0 : index
    %c18 = arith.constant 18 : index
    %31 = vector.load %arg4[%c0_30, %c0_31, %c18] : memref<1x4x342xf32, #tpu.memory_space<vmem>>, vector<1x4x288xf32>
    %32 = vector.shape_cast %31 : vector<1x4x288xf32> to vector<4x288xf32>
    %c3 = arith.constant 3 : index
    %c0_32 = arith.constant 0 : index
    %c0_33 = arith.constant 0 : index
    %33 = vector.load %arg5[%c3, %c0_32, %c0_33] : memref<9x8x4xf32, #tpu.memory_space<vmem>>, vector<1x8x4xf32>
    %34 = vector.shape_cast %33 : vector<1x8x4xf32> to vector<8x4xf32>
    %cst_34 = arith.constant dense<0.000000e+00> : vector<8x288xf32>
    %35 = tpu.matmul %34, %32, %cst_34 {dimension_numbers = #tpu.dot_dimension_numbers<[1], [0], [0], [1], [0, 0, 1, 1], [], []>} : vector<8x4xf32>, vector<4x288xf32>, vector<8x288xf32> -> vector<8x288xf32>
    %36 = arith.addf %30, %35 : vector<8x288xf32>
    %c0_35 = arith.constant 0 : index
    %c0_36 = arith.constant 0 : index
    %c19 = arith.constant 19 : index
    %37 = vector.load %arg4[%c0_35, %c0_36, %c19] : memref<1x4x342xf32, #tpu.memory_space<vmem>>, vector<1x4x288xf32>
    %38 = vector.shape_cast %37 : vector<1x4x288xf32> to vector<4x288xf32>
    %c4 = arith.constant 4 : index
    %c0_37 = arith.constant 0 : index
    %c0_38 = arith.constant 0 : index
    %39 = vector.load %arg5[%c4, %c0_37, %c0_38] : memref<9x8x4xf32, #tpu.memory_space<vmem>>, vector<1x8x4xf32>
    %40 = vector.shape_cast %39 : vector<1x8x4xf32> to vector<8x4xf32>
    %cst_39 = arith.constant dense<0.000000e+00> : vector<8x288xf32>
    %41 = tpu.matmul %40, %38, %cst_39 {dimension_numbers = #tpu.dot_dimension_numbers<[1], [0], [0], [1], [0, 0, 1, 1], [], []>} : vector<8x4xf32>, vector<4x288xf32>, vector<8x288xf32> -> vector<8x288xf32>
    %42 = arith.addf %36, %41 : vector<8x288xf32>
    %c0_40 = arith.constant 0 : index
    %c0_41 = arith.constant 0 : index
    %c20 = arith.constant 20 : index
    %43 = vector.load %arg4[%c0_40, %c0_41, %c20] : memref<1x4x342xf32, #tpu.memory_space<vmem>>, vector<1x4x288xf32>
    %44 = vector.shape_cast %43 : vector<1x4x288xf32> to vector<4x288xf32>
    %c5 = arith.constant 5 : index
    %c0_42 = arith.constant 0 : index
    %c0_43 = arith.constant 0 : index
    %45 = vector.load %arg5[%c5, %c0_42, %c0_43] : memref<9x8x4xf32, #tpu.memory_space<vmem>>, vector<1x8x4xf32>
    %46 = vector.shape_cast %45 : vector<1x8x4xf32> to vector<8x4xf32>
    %cst_44 = arith.constant dense<0.000000e+00> : vector<8x288xf32>
    %47 = tpu.matmul %46, %44, %cst_44 {dimension_numbers = #tpu.dot_dimension_numbers<[1], [0], [0], [1], [0, 0, 1, 1], [], []>} : vector<8x4xf32>, vector<4x288xf32>, vector<8x288xf32> -> vector<8x288xf32>
    %48 = arith.addf %42, %47 : vector<8x288xf32>
    %c0_45 = arith.constant 0 : index
    %c0_46 = arith.constant 0 : index
    %c36 = arith.constant 36 : index
    %49 = vector.load %arg4[%c0_45, %c0_46, %c36] : memref<1x4x342xf32, #tpu.memory_space<vmem>>, vector<1x4x288xf32>
    %50 = vector.shape_cast %49 : vector<1x4x288xf32> to vector<4x288xf32>
    %c6 = arith.constant 6 : index
    %c0_47 = arith.constant 0 : index
    %c0_48 = arith.constant 0 : index
    %51 = vector.load %arg5[%c6, %c0_47, %c0_48] : memref<9x8x4xf32, #tpu.memory_space<vmem>>, vector<1x8x4xf32>
    %52 = vector.shape_cast %51 : vector<1x8x4xf32> to vector<8x4xf32>
    %cst_49 = arith.constant dense<0.000000e+00> : vector<8x288xf32>
    %53 = tpu.matmul %52, %50, %cst_49 {dimension_numbers = #tpu.dot_dimension_numbers<[1], [0], [0], [1], [0, 0, 1, 1], [], []>} : vector<8x4xf32>, vector<4x288xf32>, vector<8x288xf32> -> vector<8x288xf32>
    %54 = arith.addf %48, %53 : vector<8x288xf32>
    %c0_50 = arith.constant 0 : index
    %c0_51 = arith.constant 0 : index
    %c37 = arith.constant 37 : index
    %55 = vector.load %arg4[%c0_50, %c0_51, %c37] : memref<1x4x342xf32, #tpu.memory_space<vmem>>, vector<1x4x288xf32>
    %56 = vector.shape_cast %55 : vector<1x4x288xf32> to vector<4x288xf32>
    %c7 = arith.constant 7 : index
    %c0_52 = arith.constant 0 : index
    %c0_53 = arith.constant 0 : index
    %57 = vector.load %arg5[%c7, %c0_52, %c0_53] : memref<9x8x4xf32, #tpu.memory_space<vmem>>, vector<1x8x4xf32>
    %58 = vector.shape_cast %57 : vector<1x8x4xf32> to vector<8x4xf32>
    %cst_54 = arith.constant dense<0.000000e+00> : vector<8x288xf32>
    %59 = tpu.matmul %58, %56, %cst_54 {dimension_numbers = #tpu.dot_dimension_numbers<[1], [0], [0], [1], [0, 0, 1, 1], [], []>} : vector<8x4xf32>, vector<4x288xf32>, vector<8x288xf32> -> vector<8x288xf32>
    %60 = arith.addf %54, %59 : vector<8x288xf32>
    %c0_55 = arith.constant 0 : index
    %c0_56 = arith.constant 0 : index
    %c38 = arith.constant 38 : index
    %61 = vector.load %arg4[%c0_55, %c0_56, %c38] : memref<1x4x342xf32, #tpu.memory_space<vmem>>, vector<1x4x288xf32>
    %62 = vector.shape_cast %61 : vector<1x4x288xf32> to vector<4x288xf32>
    %c8 = arith.constant 8 : index
    %c0_57 = arith.constant 0 : index
    %c0_58 = arith.constant 0 : index
    %63 = vector.load %arg5[%c8, %c0_57, %c0_58] : memref<9x8x4xf32, #tpu.memory_space<vmem>>, vector<1x8x4xf32>
    %64 = vector.shape_cast %63 : vector<1x8x4xf32> to vector<8x4xf32>
    %cst_59 = arith.constant dense<0.000000e+00> : vector<8x288xf32>
    %65 = tpu.matmul %64, %62, %cst_59 {dimension_numbers = #tpu.dot_dimension_numbers<[1], [0], [0], [1], [0, 0, 1, 1], [], []>} : vector<8x4xf32>, vector<4x288xf32>, vector<8x288xf32> -> vector<8x288xf32>
    %66 = arith.addf %60, %65 : vector<8x288xf32>
    %c0_60 = arith.constant 0 : index
    %c0_61 = arith.constant 0 : index
    %67 = vector.load %arg6[%c0_60, %c0_61] : memref<8x1xf32, #tpu.memory_space<vmem>>, vector<8x1xf32>
    %68 = vector.broadcast %67 : vector<8x1xf32> to vector<8x288xf32>
    %69 = arith.addf %66, %68 : vector<8x288xf32>
    %cst_62 = arith.constant 0.000000e+00 : f32
    %70 = vector.broadcast %cst_62 : f32 to vector<8x288xf32>
    %71 = arith.maximumf %69, %70 : vector<8x288xf32>
    %c0_63 = arith.constant 0 : index
    %c0_64 = arith.constant 0 : index
    %c0_65 = arith.constant 0 : index
    %72 = vector.load %arg8[%c0_63, %c0_64, %c0_65] : memref<1x8x288xf32, #tpu.memory_space<vmem>>, vector<1x8x288xf32>
    %73 = vector.shape_cast %72 : vector<1x8x288xf32> to vector<8x288xf32>
    %74 = vector.shape_cast %71 : vector<8x288xf32> to vector<1x8x288xf32>
    tpu.vector_store %arg8[%c0_63, %c0_64, %c0_65], %74 {strides = array<i32>} : memref<1x8x288xf32, #tpu.memory_space<vmem>>, vector<1x8x288xf32>,
    return
  }
  func.func @transform_0(%arg0: i32) -> (i32, i32, i32) {
    %c0_i32 = arith.constant 0 : i32
    %c0_i32_0 = arith.constant 0 : i32
    %c0_i32_1 = arith.constant 0 : i32
    return %arg0, %c0_i32, %c0_i32_0 : i32, i32, i32
  }
  func.func @transform_1(%arg0: i32) -> (i32, i32) {
    %c0_i32 = arith.constant 0 : i32
    %c0_i32_0 = arith.constant 0 : i32
    %c0_i32_1 = arith.constant 0 : i32
    return %c0_i32, %c0_i32_0 : i32, i32
  }
  func.func @transform_2(%arg0: i32) -> (i32, i32) {
    %c0_i32 = arith.constant 0 : i32
    %c0_i32_0 = arith.constant 0 : i32
    %c0_i32_1 = arith.constant 0 : i32
    return %c0_i32, %c0_i32_0 : i32, i32
  }
  func.func @transform_3(%arg0: i32) -> (i32, i32, i32) {
    %c0_i32 = arith.constant 0 : i32
    %c0_i32_0 = arith.constant 0 : i32
    %c0_i32_1 = arith.constant 0 : i32
    return %arg0, %c0_i32, %c0_i32_0 : i32, i32, i32
  }
  func.func @transform_4(%arg0: i32) -> (i32, i32, i32) {
    %c0_i32 = arith.constant 0 : i32
    %c0_i32_0 = arith.constant 0 : i32
    %c0_i32_1 = arith.constant 0 : i32
    %c0_i32_2 = arith.constant 0 : i32
    return %c0_i32, %c0_i32_0, %c0_i32_1 : i32, i32, i32
  }
  func.func @transform_5(%arg0: i32) -> (i32, i32) {
    %c0_i32 = arith.constant 0 : i32
    %c0_i32_0 = arith.constant 0 : i32
    %c0_i32_1 = arith.constant 0 : i32
    return %c0_i32, %c0_i32_0 : i32, i32
  }
  func.func @transform_6(%arg0: i32) -> (i32, i32, i32) {
    %c0_i32 = arith.constant 0 : i32
    %c0_i32_0 = arith.constant 0 : i32
    %c0_i32_1 = arith.constant 0 : i32
    return %arg0, %c0_i32, %c0_i32_0 : i32, i32, i32
  }
  func.func @transform_7(%arg0: i32) -> (i32, i32, i32) {
    %c0_i32 = arith.constant 0 : i32
    %c0_i32_0 = arith.constant 0 : i32
    %c0_i32_1 = arith.constant 0 : i32
    return %arg0, %c0_i32, %c0_i32_0 : i32, i32, i32
  }
}

</mosaic_0001>

<bundles_post_ra>
// kernel: combined_network_av.1
= control target key start
LH: loop header
LB: loop body
LE: loop exit
PB: predicated region body
PF: predicated region fallthrough
CT: control target
= control target key end

     0   :  { %13 = vsyncpa [#allocation3], 0  ;;  %s2655_s0 = inlined_call_operand.vmem [shape: f32[2,8,32], index: 0, kind: input, shape index: {}]   ;;  %s2656_s1 = inlined_call_operand.vmem [shape: f32[32,64], index: 1, kind: input, shape index: {}]   ;;  %s2657_s2 = inlined_call_operand.vmem [shape: f32[1,64], index: 2, kind: input, shape index: {}]   ;;  %s2658_s3 = inlined_call_operand.vmem [shape: f32[2,4,342], index: 3, kind: input, shape index: {}]   ;;  %s2659_s4 = inlined_call_operand.vmem [shape: f32[9,8,4], index: 4, kind: input, shape index: {}]   ;;  %s2660_s5 = inlined_call_operand.vmem [shape: f32[8,1], index: 5, kind: input, shape index: {}]   ;;  %s2661_s6 = inlined_call_operand.hbm [shape: f32[2,8,64], index: 6, kind: output, shape index: {0}]   ;;  %s2662_s7 = inlined_call_operand.vmem [shape: f32[2,8,288], index: 7, kind: output, shape index: {1}]  }
   0x1   :  { %15 = vsyncpa [#allocation3 + $0x1], 0  ;;  %s2371_s24 = smov 0   ;;  %s2373_s25 = smov 0  }
   0x2   :  { %s2375_s26 = smov 0   ;;  %s2377_s27 = smov 0  }
   0x3 LB: > { %s2392_s28 = sadd.s32 4294967295, %s2316_s27   ;;  %s2031_s29 = sadd.s32 4294967294, %s2316_s27   ;;  %s2316_s27 = sphi %s2377_s27, %s2668_s27   ;;  %s2312_s26 = sphi %s2375_s26, %s2667_s26   ;;  %s2308_s25 = sphi %s2373_s25, %s2666_s25   ;;  %s2304_s24 = sphi %s2371_s24, %s2665_s24  }
   0x4   : > { %s2396_s30 = sadd.s32 1, %s2316_s27   ;;  %s164_s8 = sadd.s32 1, %s2312_s26 }
   0x5   : > { %s161_s9 = ssub.s32 %s2316_s27, %s2396_s30  ;;  %p174_p0 = scmp.ne.s32.totalorder %s2312_s26, %s2308_s25 }
   0x6   : > { %p162_p1 = scmp.eq.s32.totalorder %s161_s9, 0  ;;  %p175_p2 = scmp.eq.s32.totalorder %s2392_s28, 1 }
   0x7   : > { %p180_p3 = scmp.ne.s32.totalorder %s2308_s25, %s2304_s24  ;;  %p181_p4 = scmp.eq.s32.totalorder %s2031_s29, 1 }
   0x8   : > { %s2407_s10 = scalar_select %p162_p1, %s2312_s26, %s164_s8  }
   0x9   : > { %p2409_p5 = por %p175_p2, %p174_p0  ;;  %p2413_p6 = por %p181_p4, %p180_p3 }
   0xa   : > { %p2034_p7 = scmp.ge.s32.totalorder %s2316_s27, 1  ;;  %p252_p8 = scmp.lt.s32.totalorder %s2316_s27, 3 }
   0xc   : > { %p253_p9 = pnand %p2034_p7, %p252_p8 }
   0xd   : > { %p293_p10 = scmp.lt.s32.totalorder (!%p253_p9), %s2392_s28, 1  ;;  %v308_v0 = vld [vmem:[%s2656_s1] sm:$0xff] (!%p253_p9)  ;;  %v309_v1 = vld [vmem:[%s2656_s1 + $0x8] sm:$0xff] (!%p253_p9)  ;;  %v310_v2 = vld [vmem:[%s2656_s1 + $0x10] sm:$0xff] (!%p253_p9)  ;;  %v2318_v3 = vmov (!%p253_p9), 0.0|0.0   ;;  %vm2319_vm0 = vmmov (!%p253_p9), 0  }
   0xe   : > { %256 = sbr.rel (%p253_p9) target bundleno = 433 (0x1b1), region = 44  ;;  %2177 = vmatprep.subr.bf16.mxu0 (!%p253_p9), %v2318_v3  ;;  %v2178_v4 = vpack.c.bf16 (!%p253_p9), %v309_v1, %v308_v0  ;;  %v311_v5 = vld [vmem:[%s2656_s1 + $0x18] sm:$0xff] (!%p253_p9)  ;;  %v2320_v6 = vmov (!%p253_p9), 0.0   ;;  %s2321_s16 = smov (!%p253_p9), 127   ;;  %vm319_vm1 = vcmask (!%p253_p9), 261120   ;;  %vm417_vm2 = vcmask (!%p253_p9), 1043456  }
   0xf   : > { %2129 = vmatprep.mubr.msk.f32.mxu0 (!%p253_p9), %vm2319_vm0, %v2320_v6  ;;  %488 = vmatprep.mubr.f32.mxu1 (!%p253_p9), %v2320_v6  ;;  %v2181_v7 = vpack.c.bf16 (!%p253_p9), %v311_v5, %v310_v2  ;;  %s2322_s17 = smov (!%p253_p9), 126   ;;  %vm413_vm3 = vcmask (!%p253_p9), 31744   ;;  %v2465_v12 = vld [vmem:[%s2659_s4] sm:$0xff] (!%p253_p9)  ;;  %s2323_s20 = smov (!%p253_p9), 110   ;;  %v2329_v21 = vmov (!%p253_p9), 0   ;;  %vm410_vm4 = vcmask (!%p253_p9), 1039360  }
  0x10   : > { %2179 = vmatpush3.bf16.msra.mxu0 (!%p253_p9), %v2178_v4  ;;  %s2325_s23 = smov (!%p253_p9), 108   ;;  %s2326_s29 = smov (!%p253_p9), 92   ;;  %v1898_v20 = vld [vmem:[%s2660_s5] sm:$0xff] (!%p253_p9)  ;;  %2252 = vset.pattern.permute.xlu0 (!%p253_p9), %v2329_v21  ;;  %v2041_v27 = vld [vmem:[%s2659_s4 + $0x8] sm:$0xff] (!%p253_p9)  ;;  %vm728_vm5 = vcmask (!%p253_p9), 1031168   ;;  %v2052_v31 = vld [vmem:[%s2659_s4 + $0x10] sm:$0xff] (!%p253_p9) }
  0x11   : > { %2180 = vmatprep.subr.bf16.mxu0 (!%p253_p9), %v2318_v3  ;;  %s2328_s13 = smov (!%p253_p9), 90   ;;  %vm897_vm6 = vcmask (!%p253_p9), 900096   ;;  %v2058_v35 = vld [vmem:[%s2659_s4 + $0x18] sm:$0xff] (!%p253_p9)  ;;  %v2064_v41 = vld [vmem:[%s2659_s4 + $0x20] sm:$0xff] (!%p253_p9)  ;;  %vm1066_vm7 = vcmask (!%p253_p9), 891904   ;;  %v2070_v46 = vld [vmem:[%s2659_s4 + $0x28] sm:$0xff] (!%p253_p9) }
  0x12   : > { %vm1235_vm8 = vcmask (!%p253_p9), 883712   ;;  %v2076_v52 = vld [vmem:[%s2659_s4 + $0x30] sm:$0xff] (!%p253_p9)  ;;  %v2082_v56 = vld [vmem:[%s2659_s4 + $0x38] sm:$0xff] (!%p253_p9)  ;;  %vm1404_vm9 = vcmask (!%p253_p9), 752640   ;;  %v2088_v61 = vld [vmem:[%s2659_s4 + $0x40] sm:$0xff] (!%p253_p9)  ;;  %vm1573_vm10 = vcmask (!%p253_p9), 744448  }
  0x13   : > { %vm1742_vm11 = vcmask (!%p253_p9), 736256   ;;  %vm394_vm12 = vcmask (!%p253_p9), 523264  }
  0x14   : > { %2182 = vmatpush3.bf16.msra.mxu0 (!%p253_p9), %v2181_v7 }
  0x15   : > { %s2433_s21 = scalar_select %p293_p10, %s2392_s28, 1  ;;  %2137 = vmatprep.subr.mxu0 %v2320_v6 }
  0x17   : > { %s2199_s22 = smul.u32 12, %s2433_s21  ;;  %s2036_s9 = sshll.u32 %s2433_s21, 3 }
  0x18   : > { %s296_s15 = scalar_lea.vmem %s2655_s0, %s2036_s9  ;;  %s2327_s9 = smov 91  }
  0x19   : > { %s2442_s8 = scalar_lea.vmem %s2658_s3, %s2199_s22  ;;  %v307_v10 = vld [vmem:[%s296_s15] sm:$0xff]  ;;  %s2324_s22 = smov 109  }
  0x1a   : > { %v2446_v8 = vld [vmem:[%s2442_s8] sm:$0xff]  ;;  %v397_v11 = vld [vmem:[%s2442_s8 + $0x8] sm:$0xf]  ;;  %2130 = vmatmul.mubr.msk.f32.vlgmr.msra.gmra.mrb[0].mxu0 %vm319_vm1, %v307_v10 }
  0x1b   : > { %404 = vrot.lane.b32.xlu1 %v2446_v8, %s2321_s16  ;;  %v2454_v9 = vcombine.high %v2446_v8, %v2446_v8  ;;  %2138 = vmatpush3.msk.msra.mxu0 %vm417_vm2, %v397_v11  ;;  %v716_v13 = vld [vmem:[%s2442_s8 + $0x8] sm:$0xf] }
  0x1c   : > { %2139 = vmatprep.mubr.msk.f32.mxu0 %vm2319_vm0, %v2320_v6  ;;  %2142 = vmatprep.subr.mxu0 %v2320_v6  ;;  %v885_v14 = vld [vmem:[%s2442_s8 + $0x8] sm:$0xf] }
  0x1d   : > { %406 = vrot.lane.b32.xlu0 %v2454_v9, %s2321_s16  ;;  %v1054_v15 = vld [vmem:[%s2442_s8 + $0x8] sm:$0xf] }
  0x1e   : > { %2140 = vmatmul.mubr.msk.f32.vlgmr.msra.gmra.mrb[2].mxu0 %vm413_vm3, %v2465_v12  ;;  %v1223_v16 = vld [vmem:[%s2442_s8 + $0x8] sm:$0xf] }
  0x1f   : > { %724 = vrot.lane.b32.xlu1 %v2454_v9, %s2322_s17  ;;  %2144 = vmatprep.mubr.msk.f32.mxu0 %vm2319_vm0, %v2320_v6  ;;  %v1392_v17 = vld [vmem:[%s2442_s8 + $0x8] sm:$0xf] }
  0x20   : > { %v1561_v18 = vld [vmem:[%s2442_s8 + $0x8] sm:$0xf] }
  0x21   : > { %408 = vrot.lane.b32.xlu0 %v397_v11, %s2321_s16  ;;  %v1730_v19 = vld [vmem:[%s2442_s8 + $0x8] sm:$0xf]  ;;  %v2039_v11 = vld [vmem:[%s2657_s2] ss:$0 sm:$0xff]  ;;  %s2330_s8 = smov [#allocation2]  }
  0x22   : > { %s2258_s18 = sshll.u32 %s2330_s8, 4  ;;  %s2259_s18 = int_to_ptr.vmem [resolvable:$false] %s2258_s18 }
  0x23   : > { %722 = vrot.lane.b32.xlu1 %v2446_v8, %s2322_s17  ;;  %s2260_s19 = scalar_lea.vmem %s2259_s18, 256 }
  0x25   : > { %726 = vrot.lane.b32.xlu0 %v716_v13, %s2322_s17 }
  0x27   : > { %895 = vrot.lane.b32.xlu1 %v885_v14, %s2323_s20 }
  0x29   : > { %893 = vrot.lane.b32.xlu0 %v2454_v9, %s2323_s20 }
  0x2b   : > { %1062 = vrot.lane.b32.xlu1 %v2454_v9, %s2324_s22 }
  0x2d   : > { %891 = vrot.lane.b32.xlu0 %v2446_v8, %s2323_s20  ;;  %s283_s20 = sand.u32 1, %s2308_s25  }
  0x2e   : > { %s1914_s16 = scalar_lea.sflag [#allocation3], %s283_s20 }
  0x2f   : > { %1060 = vrot.lane.b32.xlu1 %v2446_v8, %s2324_s22 }
  0x31   : > { %1064 = vrot.lane.b32.xlu0 %v1054_v15, %s2324_s22  ;;  %s2035_s22 = sshll.u32 %s283_s20, 3 }
  0x33   : > { %1233 = vrot.lane.b32.xlu1 %v1223_v16, %s2325_s23 }
  0x35   : > { %1231 = vrot.lane.b32.xlu0 %v2454_v9, %s2325_s23 }
  0x37   : > { %1400 = vrot.lane.b32.xlu1 %v2454_v9, %s2326_s29 }
  0x39   : > { %1229 = vrot.lane.b32.xlu0 %v2446_v8, %s2325_s23  ;;  %s285_s23 = scalar_lea.vmem [#allocation2], %s2035_s22 }
  0x3b   : > { %1398 = vrot.lane.b32.xlu1 %v2446_v8, %s2326_s29 }
  0x3d   : > { %1402 = vrot.lane.b32.xlu0 %v1392_v17, %s2326_s29  ;;  %s2095_s29 = sshll.u32 %s2392_s28, 7 }
  0x3e   : > { %s2614_s15 = scalar_lea.hbm %s2661_s6, %s2095_s29 }
  0x3f   : > { %1571 = vrot.lane.b32.xlu1 %v1561_v18, %s2327_s9 }
  0x41   : > { %1569 = vrot.lane.b32.xlu0 %v2454_v9, %s2327_s9 }
  0x43   : > { %1738 = vrot.lane.b32.xlu1 %v2454_v9, %s2328_s13 }
  0x45   : > { %1567 = vrot.lane.b32.xlu0 %v2446_v8, %s2327_s9  ;;  %s1932_s9 = sshll.u32 %s285_s23, 4  ;;  %s1933_s9 = int_to_ptr.vmem [resolvable:$true] %s1932_s9 }
  0x46   : > { %s2254_s17 = scalar_lea.vmem %s1933_s9, 128  ;;  %p2261_p0 = scmp.lt.s32.totalorder %s1933_s9, %s2259_s18 }
  0x47   : > { %1736 = vrot.lane.b32.xlu1 %v2446_v8, %s2328_s13  ;;  %p2255_p11 = scmp.ne.s32.totalorder %s1933_s9, %s2254_s17  ;;  %p2262_p1 = scmp.lt.s32.totalorder %s2260_s19, %s2254_s17 }
  0x49   : > { %1740 = vrot.lane.b32.xlu0 %v1730_v19, %s2328_s13  ;;  %p2256_p12 = pnand %p2255_p11, %p2409_p5  ;;  %p2263_p2 = por %p2262_p1, %p2261_p0 }
  0x4b   : > { %p2257_p13 = pneg %p2256_p12 }
  0x4d   : > { %1901 = vperm.xlu0 %2252, %v1898_v20   ;;  %p2264_p3 = pnand %p2263_p2, %p2257_p13 }
  0x8d   : > { %v405_v22 = vpop.permute.xlu1 %404 }
  0x8f   : > { %v407_v23 = vpop.permute.xlu0 %406 }
  0x90   : > { %v411_v28 = vsel %vm410_vm4, %v405_v22, %v407_v23 }
  0x91   : > { %v725_v24 = vpop.permute.xlu1 %724 }
  0x93   : > { %v409_v25 = vpop.permute.xlu0 %408 }
  0x94   : > { %v412_v26 = vsel %vm410_vm4, %v407_v23, %v409_v25 }
  0x95   : > { %2042 = vmatprep.subr.msk.mxu1 %vm417_vm2, %v412_v26  ;;  %v723_v29 = vpop.permute.xlu1 %722 }
  0x96   : > { %2043 = vmatpush1.msk.msra.mxu1 %vm417_vm2, %v411_v28  ;;  %v729_v36 = vsel %vm728_vm5, %v723_v29, %v725_v24 }
  0x97   : > { %2044 = vmatmul.mubr.msk.f32.vlgmr.msra.gmra.mrb[0].mxu1 %vm413_vm3, %v2041_v27  ;;  %2132 = vmatprep.subr.mxu1 %v2320_v6  ;;  %v727_v30 = vpop.permute.xlu0 %726 }
  0x98   : > { %2133 = vmatpush3.msk.msra.mxu1 %vm417_vm2, %v409_v25  ;;  %2134 = vmatprep.mubr.msk.f32.mxu1 %vm2319_vm0, %v2320_v6  ;;  %v730_v33 = vsel %vm728_vm5, %v725_v24, %v727_v30 }
  0x99   : > { %2047 = vmatprep.subr.msk.mxu1 %vm417_vm2, %v2454_v9  ;;  %v896_v32 = vpop.permute.xlu1 %895  ;;  %2143 = vmatpush3.msk.msra.mxu0 %vm417_vm2, %v727_v30 }
  0x9a   : > { %2145 = vmatmul.mubr.msk.f32.vlgmr.msra.gmra.mrb[4].mxu0 %vm413_vm3, %v2052_v31  ;;  %2147 = vmatprep.subr.mxu0 %v2320_v6 }
  0x9b   : > { %2135 = vmatmul.mubr.msk.f32.vlgmr.msra.gmra.mrb[2].mxu1 %vm413_vm3, %v2041_v27  ;;  %v894_v34 = vpop.permute.xlu0 %893  ;;  %2148 = vmatpush3.msk.msra.mxu0 %vm417_vm2, %v896_v32 }
  0x9c   : > { %2048 = vmatpush1.msk.msra.mxu1 %vm417_vm2, %v2446_v8  ;;  %638 = vmatprep.mubr.f32.mxu1 %v2320_v6  ;;  %v899_v38 = vsel %vm897_vm6, %v894_v34, %v896_v32 }
  0x9d   : > { %2053 = vmatprep.subr.msk.mxu1 %vm417_vm2, %v730_v33  ;;  %v1063_v37 = vpop.permute.xlu1 %1062  ;;  %2149 = vmatprep.mubr.msk.f32.mxu0 %vm2319_vm0, %v2320_v6 }
  0x9e   : > { %2150 = vmatmul.mubr.msk.f32.vlgmr.msra.gmra.mrb[6].mxu0 %vm413_vm3, %v2058_v35  ;;  %2152 = vmatprep.subr.mxu0 %v2320_v6 }
  0x9f   : > { %2049 = vmatmul.mubr.msk.f32.vlgmr.msra.gmra.mrb[0].mxu1 %vm413_vm3, %v2465_v12  ;;  %v892_v39 = vpop.permute.xlu0 %891  ;;  %2154 = vmatprep.mubr.msk.f32.mxu0 %vm2319_vm0, %v2320_v6 }
  0xa0   : > { %2054 = vmatpush1.msk.msra.mxu1 %vm417_vm2, %v729_v36  ;;  %804 = vmatprep.mubr.f32.mxu1 %v2320_v6  ;;  %v898_v43 = vsel %vm897_vm6, %v892_v39, %v894_v34 }
  0xa1   : > { %v1061_v40 = vpop.permute.xlu1 %1060  ;;  %2059 = vmatprep.subr.msk.mxu1 %vm417_vm2, %v899_v38 }
  0xa2   : > { %v1067_v50 = vsel %vm1066_vm7, %v1061_v40, %v1063_v37 }
  0xa3   : > { %v1065_v42 = vpop.permute.xlu0 %1064 }
  0xa4   : > { %2153 = vmatpush3.msk.msra.mxu0 %vm417_vm2, %v1065_v42  ;;  %v1068_v45 = vsel %vm1066_vm7, %v1063_v37, %v1065_v42 }
  0xa5   : > { %2155 = vmatmul.mubr.msk.f32.vlgmr.msra.gmra.mrb[8].mxu0 %vm413_vm3, %v2064_v41  ;;  %v1234_v44 = vpop.permute.xlu1 %1233  ;;  %2157 = vmatprep.subr.mxu0 %v2320_v6 }
  0xa6   : > { %2158 = vmatpush3.msk.msra.mxu0 %vm417_vm2, %v1234_v44  ;;  %2159 = vmatprep.mubr.msk.f32.mxu0 %vm2319_vm0, %v2320_v6 }
  0xa7   : > { %2055 = vmatmul.mubr.msk.f32.vlgmr.msra.gmra.mrb[0].mxu1 %vm413_vm3, %v2052_v31  ;;  %v1232_v47 = vpop.permute.xlu0 %1231  ;;  %2162 = vmatprep.subr.mxu0 %v2320_v6 }
  0xa8   : > { %2060 = vmatpush1.msk.msra.mxu1 %vm417_vm2, %v898_v43  ;;  %973 = vmatprep.mubr.f32.mxu1 %v2320_v6  ;;  %v1237_v53 = vsel %vm1235_vm8, %v1232_v47, %v1234_v44 }
  0xa9   : > { %2160 = vmatmul.mubr.msk.f32.vlgmr.msra.gmra.mrb[10].mxu0 %vm413_vm3, %v2070_v46  ;;  %v1401_v48 = vpop.permute.xlu1 %1400  ;;  %2065 = vmatprep.subr.msk.mxu1 %vm417_vm2, %v1068_v45 }
  0xaa   : > { %2164 = vmatprep.mubr.msk.f32.mxu0 %vm2319_vm0, %v2320_v6 }
  0xab   : > { %v1230_v49 = vpop.permute.xlu0 %1229 }
  0xac   : > { %v1236_v58 = vsel %vm1235_vm8, %v1230_v49, %v1232_v47 }
  0xad   : > { %v1399_v51 = vpop.permute.xlu1 %1398 }
  0xae   : > { %v1405_v63 = vsel %vm1404_vm9, %v1399_v51, %v1401_v48 }
  0xaf   : > { %2061 = vmatmul.mubr.msk.f32.vlgmr.msra.gmra.mrb[0].mxu1 %vm413_vm3, %v2058_v35  ;;  %v1403_v54 = vpop.permute.xlu0 %1402 }
  0xb0   : > { %2066 = vmatpush1.msk.msra.mxu1 %vm417_vm2, %v1067_v50  ;;  %2163 = vmatpush3.msk.msra.mxu0 %vm417_vm2, %v1403_v54  ;;  %v1406_v59 = vsel %vm1404_vm9, %v1401_v48, %v1403_v54 }
  0xb1   : > { %2165 = vmatmul.mubr.msk.f32.vlgmr.msra.gmra.mrb[12].mxu0 %vm413_vm3, %v2076_v52  ;;  %v1572_v55 = vpop.permute.xlu1 %1571  ;;  %2167 = vmatprep.subr.mxu0 %v2320_v6 }
  0xb2   : > { %2071 = vmatprep.subr.msk.mxu1 %vm417_vm2, %v1237_v53  ;;  %2168 = vmatpush3.msk.msra.mxu0 %vm417_vm2, %v1572_v55 }
  0xb3   : > { %v1570_v57 = vpop.permute.xlu0 %1569  ;;  %2169 = vmatprep.mubr.msk.f32.mxu0 %vm2319_vm0, %v2320_v6  ;;  %1142 = vmatprep.mubr.f32.mxu1 %v2320_v6 }
  0xb4   : > { %2172 = vmatprep.subr.mxu0 %v2320_v6  ;;  %v1575_v0 = vsel %vm1573_vm10, %v1570_v57, %v1572_v55 }
  0xb5   : > { %2170 = vmatmul.mubr.msk.f32.vlgmr.msra.gmra.mrb[14].mxu0 %vm413_vm3, %v2082_v56  ;;  %v1739_v1 = vpop.permute.xlu1 %1738 }
  0xb6   : > { %2174 = vmatprep.mubr.msk.f32.mxu0 %vm2319_vm0, %v2320_v6 }
  0xb7   : > { %2067 = vmatmul.mubr.msk.f32.vlgmr.msra.gmra.mrb[0].mxu1 %vm413_vm3, %v2064_v41  ;;  %v1568_v60 = vpop.permute.xlu0 %1567 }
  0xb8   : > { %2072 = vmatpush1.msk.msra.mxu1 %vm417_vm2, %v1236_v58  ;;  %1311 = vmatprep.mubr.f32.mxu1 %v2320_v6  ;;  %v1574_v2 = vsel %vm1573_vm10, %v1568_v60, %v1570_v57 }
  0xb9   : > { %2077 = vmatprep.subr.msk.mxu1 %vm417_vm2, %v1406_v59  ;;  %v1737_v4 = vpop.permute.xlu1 %1736 }
  0xba   : > { %v1743_v5 = vsel %vm1742_vm11, %v1737_v4, %v1739_v1 }
  0xbb   : > { %v1741_v62 = vpop.permute.xlu0 %1740 }
  0xbc   : > { %2173 = vmatpush3.msk.msra.mxu0 %vm417_vm2, %v1741_v62  ;;  %v1744_v3 = vsel %vm1742_vm11, %v1739_v1, %v1741_v62 }
  0xbd   : > { %2175 = vmatmul.mubr.msk.f32.vlgmr.msra.gmra.mrb[16].mxu0 %vm413_vm3, %v2088_v61 }
  0xbf   : > { %2073 = vmatmul.mubr.msk.f32.vlgmr.msra.gmra.mrb[0].mxu1 %vm413_vm3, %v2070_v46 }
  0xc0   : > { %2078 = vmatpush1.msk.msra.mxu1 %vm417_vm2, %v1405_v63  ;;  %1480 = vmatprep.mubr.f32.mxu1 %v2320_v6 }
  0xc1   : > { %2083 = vmatprep.subr.msk.mxu1 %vm417_vm2, %v1575_v0 }
  0xc7   : > { %2079 = vmatmul.mubr.msk.f32.vlgmr.msra.gmra.mrb[0].mxu1 %vm413_vm3, %v2076_v52 }
  0xc8   : > { %2084 = vmatpush1.msk.msra.mxu1 %vm417_vm2, %v1574_v2  ;;  %1649 = vmatprep.mubr.f32.mxu1 %v2320_v6 }
  0xc9   : > { %2089 = vmatprep.subr.msk.mxu1 %vm417_vm2, %v1744_v3 }
  0xcf   : > { %2085 = vmatmul.mubr.msk.f32.vlgmr.msra.gmra.mrb[0].mxu1 %vm413_vm3, %v2082_v56 }
  0xd0   : > { %2090 = vmatpush1.msk.msra.mxu1 %vm417_vm2, %v1743_v5  ;;  %1818 = vmatprep.mubr.f32.mxu1 %v2320_v6 }
  0xd7   : > { %2091 = vmatmul.mubr.msk.f32.vlgmr.msra.gmra.mrb[0].mxu1 %vm413_vm3, %v2088_v61 }
  0xed   : > { %v389_v7 = vpop.f32.mrb[0].mxu0 }
  0xee   : > { %v2131_v8 = vpop.f32.mrb[1].mxu0  ;;  %v390_v12 = vadd.f32 %v2039_v11, %v389_v7 }
  0xf0   : > { %v393_v13 = vmax.f32 %v390_v12, 0.0 }
  0xf1   : > { %v711_v9 = vpop.f32.mrb[2].mxu0 }
  0xf2   : > { %v2141_v10 = vpop.f32.mrb[3].mxu0  ;;  %395 = vst.msk [vmem:[%s285_s23] sm:$0xff] %vm394_vm12, %v393_v13 }
  0xf3   : > { %2267 = shalt.err (!%p2264_p3)
}
  0xf4   : > { %s2268_s28 = scalar_lea.hbm %s2614_s15, 128  ;;  %s2272_s23 = scalar_lea.hbm %s2661_s6, 256 }
  0xf5   : > { %p2269_p4 = scmp.ne.s32.totalorder %s2614_s15, %s2268_s28  ;;  %p2273_p9 = scmp.lt.u32.totalorder %s2614_s15, %s2661_s6 }
  0xf6   : > { %p2274_p10 = scmp.lt.u32.totalorder %s2272_s23, %s2268_s28  ;;  %p2276_p12 = scmp.lt.u32.totalorder %s2268_s28, %s2614_s15 }
  0xf7   : > { %p2270_p7 = pnand %p2269_p4, %p2409_p5 }
  0xf8   : > { %p2275_p11 = por %p2274_p10, %p2273_p9 }
  0xf9   : > { %p2271_p8 = pneg %p2270_p7 }
  0xfa   : > { %p2277_p13 = por %p2276_p12, %p2275_p11 }
  0xfc   : > { %p2278_p0 = pnand %p2277_p13, %p2271_p8 }
  0xfe   : > { %2281 = shalt.err (!%p2278_p0)
}
  0xff   : > { %2201 = dma.vmem_to_hbm [thread:$0]  (%p2409_p5), %s1933_s9, 128, %s2614_s15, %s1914_s16   ;;  %v1902_v35 = vpop.permute.xlu0 %1901 }
 0x100   : > { %s2200_s11 = smul.u32 24, %s2433_s21 }
 0x102   : > { %s306_s15 = scalar_lea.vmem %s2662_s7, %s2200_s11 }
 0x16d   : > { %v877_v6 = vpop.f32.mrb[4].mxu0 }
 0x16e   : > { %v561_v14 = vpop.f32.mrb[2].mxu1  ;;  %v2146_v15 = vpop.f32.mrb[5].mxu0 }
 0x16f   : > { %v2136_v16 = vpop.f32.mrb[3].mxu1  ;;  %v712_v17 = vadd.f32 %v711_v9, %v561_v14 }
 0x171   : > { %v883_v18 = vadd.f32 %v877_v6, %v712_v17  ;;  %v1046_v19 = vpop.f32.mrb[6].mxu0 }
 0x172   : > { %v2151_v20 = vpop.f32.mrb[7].mxu0 }
 0x173   : > { %v1052_v21 = vadd.f32 %v1046_v19, %v883_v18 }
 0x178   : > { %v1215_v22 = vpop.f32.mrb[8].mxu0 }
 0x179   : > { %v1221_v23 = vadd.f32 %v1215_v22, %v1052_v21  ;;  %v2156_v24 = vpop.f32.mrb[9].mxu0 }
 0x17c   : > { %v1384_v25 = vpop.f32.mrb[10].mxu0 }
 0x17d   : > { %v1390_v26 = vadd.f32 %v1384_v25, %v1221_v23  ;;  %v2161_v27 = vpop.f32.mrb[11].mxu0 }
 0x184   : > { %v1553_v28 = vpop.f32.mrb[12].mxu0 }
 0x185   : > { %v1559_v29 = vadd.f32 %v1553_v28, %v1390_v26  ;;  %v2166_v30 = vpop.f32.mrb[13].mxu0 }
 0x188   : > { %v1722_v31 = vpop.f32.mrb[14].mxu0 }
 0x189   : > { %v1728_v32 = vadd.f32 %v1722_v31, %v1559_v29  ;;  %v2171_v33 = vpop.f32.mrb[15].mxu0 }
 0x190   : > { %v1891_v34 = vpop.f32.mrb[16].mxu0 }
 0x191   : > { %v1897_v36 = vadd.f32 %v1891_v34, %v1728_v32  ;;  %v2176_v37 = vpop.f32.mrb[17].mxu0 }
 0x193   : > { %v1906_v38 = vadd.f32 %v1902_v35, %v1897_v36 }
 0x195   : > { %v1909_v39 = vmax.f32 %v1906_v38, 0.0 }
 0x197   : > { %1912 = vst.msk [vmem:[%s306_s15 + $0x10] sm:$0xff] %vm319_vm1, %v1909_v39 }
 0x1aa   : > { %v1820_v40 = vpop.f32.mrb[0].mxu1 }
 0x1ab   : > { %v1904_v41 = vadd.f32 %v1902_v35, %v1820_v40  ;;  %v1822_v42 = vpop.f32.mrb[1].mxu1 }
 0x1ac   : > { %v1905_v43 = vadd.f32 %v1902_v35, %v1822_v42 }
 0x1ad   : > { %v1907_v44 = vmax.f32 %v1904_v41, 0.0 }
 0x1ae   : > { %v1908_v45 = vmax.f32 %v1905_v43, 0.0 }
 0x1af   : > { %1910 = vst [vmem:[%s306_s15] sm:$0xff] %v1907_v44 }
 0x1b0   : > { %1911 = vst [vmem:[%s306_s15 + $0x8] sm:$0xff] %v1908_v45 }
 0x1b1 PF: > { %p2207_p5 = scmp.ge.s32.totalorder %s2316_s27, 2  ;;  %s1947_s21 = sand.u32 1, %s2304_s24  }
 0x1b2   : > { %s1948_s16 = scalar_lea.sflag [#allocation3], %s1947_s21 }
 0x1b3   : > { %p2204_p1 = pnand %p2207_p5, %p2413_p6 }
 0x1b5   : > { %2299 = dma.done.wait (!%p2204_p1), %s1948_s16, 128  }
 0x1b6   : > { %2301 = vsyncadd (!%p2204_p1), %s1948_s16, 4294967168  ;;  %p18_p2 = scmp.ge.s32.totalorder %s2396_s30, 4   ;;  %s2665_s24 = smov %s2308_s25 }
 0x1b7   : > { %s2666_s25 = smov %s2312_s26  ;;  %s2667_s26 = smov %s2407_s10 }
 0x1b8   : > { %s2668_s27 = smov %s2396_s30  ;;  %20 = sbr.rel (!%p18_p2) target bundleno = 3 (0x3), region = 102 }
 0x1bf   :  { %1961 = vsyncpa [#allocation3], 1 }
 0x1c0   :  { %1963 = vsyncpa [#allocation3 + $0x1], 1 }

</bundles_post_ra>
